<compile_context>
chip_gen: v6e
topology: v6e:2x2x1
jax: 0.10.0
libtpu: 0.0.40
codegen_flags: <defaults>
</compile_context>

<pallas_src>
import jax
import jax.numpy as jnp
from jax import lax
from jax.experimental import pallas as pl
from jax.experimental.pallas import tpu as pltpu

EPS = 1e-07


def _round_up(x, m):
    return ((x + m - 1) // m) * m


def _pick_row_tile(n):
    # Large tiles for real workloads; small (sublane-aligned) tile for toy N.
    return 512 if n >= 512 else _round_up(n, 8)


def _pick_col_tile(f_pad):
    for tn in (512, 384, 256, 128):
        if f_pad % tn == 0:
            return tn
    return 128


def _decoder_kernel(b_ref, u_ref, v_ref, scale_ref, bias_ref, stdt_ref,
                    loc_out_ref, std_out_ref):
    # b_ref     : (tm, 1)   int32 batch index per row
    # u_ref     : (tm, Kp)  data-embedding row tile
    # v_ref     : (tn, Kp)  feature-embedding tile (contracted on K; no v.T)
    # scale_ref : (NBp, tn) softplus(scale_lin) table        (VMEM resident)
    # bias_ref  : (NBp, tn) bias table                       (VMEM resident)
    # stdt_ref  : (NBp, tn) softplus(std_lin) + EPS table    (VMEM resident)
    uv = lax.dot_general(
        u_ref[...], v_ref[...],
        dimension_numbers=(((1,), (1,)), ((), ())),
        preferred_element_type=jnp.float32)                       # (tm, tn) MXU

    tm = b_ref.shape[0]
    nb = scale_ref.shape[0]
    # Exact in-kernel batch gather: 0/1 one-hot rows select table rows.
    # HIGHEST precision so the f32 table values are not bf16-truncated by the
    # MXU passes (keeps the gather bit-faithful to the reference).
    one_hot = (lax.broadcasted_iota(jnp.int32, (tm, nb), 1)
               == b_ref[...]).astype(jnp.float32)                 # (tm, NBp)
    gather = lambda tab: jnp.dot(one_hot, tab,
                                 precision=lax.Precision.HIGHEST,
                                 preferred_element_type=jnp.float32)
    scale = gather(scale_ref[...])
    bias = gather(bias_ref[...])
    std = gather(stdt_ref[...])

    loc_out_ref[...] = (scale * uv + bias).astype(loc_out_ref.dtype)
    std_out_ref[...] = std.astype(std_out_ref.dtype)


@jax.jit
def normal_data_decoder(u, v, b, scale_lin, bias, std_lin):
    """Returns ((loc, std), adj_rec) — parameters of Normal(loc, std)."""
    N, K = u.shape
    F_out = v.shape[0]
    NB = scale_lin.shape[0]

    # Hoist all transcendental work onto the tiny (n_batches, F) tables.
    scale_tab = jax.nn.softplus(scale_lin.astype(jnp.float32))
    bias_tab = bias.astype(jnp.float32)
    std_tab = jax.nn.softplus(std_lin.astype(jnp.float32)) + EPS

    # Hardware-friendly padded sizes (lanes = 128, f32 sublanes = 8).
    K_pad = _round_up(K, 128)
    F_pad = _round_up(F_out, 128)
    NB_pad = _round_up(NB, 8)
    tm = _pick_row_tile(N)
    tn = _pick_col_tile(F_pad)
    N_pad = _round_up(N, tm)

    u_p = jnp.pad(u.astype(jnp.float32), ((0, N_pad - N), (0, K_pad - K)))
    v_p = jnp.pad(v.astype(jnp.float32), ((0, F_pad - F_out), (0, K_pad - K)))
    b_p = jnp.pad(b.astype(jnp.int32), (0, N_pad - N)).reshape(N_pad, 1)
    tab_pads = ((0, NB_pad - NB), (0, F_pad - F_out))
    scale_p = jnp.pad(scale_tab, tab_pads)
    bias_p = jnp.pad(bias_tab, tab_pads)
    std_p = jnp.pad(std_tab, tab_pads)

    grid = (N_pad // tm, F_pad // tn)

    loc_p, stdo_p = pl.pallas_call(
        _decoder_kernel,
        out_shape=(
            jax.ShapeDtypeStruct((N_pad, F_pad), jnp.float32),
            jax.ShapeDtypeStruct((N_pad, F_pad), jnp.float32),
        ),
        grid_spec=pltpu.PrefetchScalarGridSpec(
            num_scalar_prefetch=0,
            grid=grid,
            in_specs=[
                pl.BlockSpec((tm, 1), lambda i, j: (i, 0)),        # b (row tile)
                pl.BlockSpec((tm, K_pad), lambda i, j: (i, 0)),    # u row tile
                pl.BlockSpec((tn, K_pad), lambda i, j: (j, 0)),    # v col tile
                pl.BlockSpec((NB_pad, tn), lambda i, j: (0, j)),   # softplus(scale_lin)
                pl.BlockSpec((NB_pad, tn), lambda i, j: (0, j)),   # bias
                pl.BlockSpec((NB_pad, tn), lambda i, j: (0, j)),   # softplus(std_lin)+EPS
            ],
            out_specs=[
                pl.BlockSpec((tm, tn), lambda i, j: (i, j)),       # loc
                pl.BlockSpec((tm, tn), lambda i, j: (i, j)),       # std
            ],
        ),
        compiler_params=pltpu.CompilerParams(
            dimension_semantics=("parallel", "parallel"),
            vmem_limit_bytes=48 * 1024 * 1024,   # headroom even on v7x (64 MiB/TC)
        ),
    )(b_p, u_p, v_p, scale_p, bias_p, std_p)

    loc = loc_p[:N, :F_out]
    std = stdo_p[:N, :F_out]
    adj_rec = None
    return (loc, std), adj_rec


def _reference(u, v, b, scale_lin, bias, std_lin):
    scale = jax.nn.softplus(scale_lin[b])
    loc = scale * (u @ v.T) + bias[b]
    std = jax.nn.softplus(std_lin[b]) + EPS
    return loc, std


def _run_case(key, N, K, F_OUT, NB):
    ks = jax.random.split(key, 6)
    u = jax.random.normal(ks[0], (N, K), dtype=jnp.float32)
    v = jax.random.normal(ks[1], (F_OUT, K), dtype=jnp.float32)
    b = jax.random.randint(ks[2], (N,), 0, NB)
    # Module __init__ uses zeros; use small deterministic values so the test
    # exercises the gather / softplus nontrivially.
    scale_lin = 0.1 * jax.random.normal(ks[3], (NB, F_OUT), dtype=jnp.float32)
    bias = 0.1 * jax.random.normal(ks[4], (NB, F_OUT), dtype=jnp.float32)
    std_lin = 0.1 * jax.random.normal(ks[5], (NB, F_OUT), dtype=jnp.float32)

    (loc, std), adj_rec = normal_data_decoder(u, v, b, scale_lin, bias, std_lin)
    jax.block_until_ready((loc, std))

    loc_ref, std_ref = _reference(u, v, b, scale_lin, bias, std_lin)
    assert loc.shape == (N, F_OUT) and std.shape == (N, F_OUT)
    assert jnp.allclose(loc, loc_ref, atol=1e-4, rtol=1e-4), \
        float(jnp.max(jnp.abs(loc - loc_ref)))
    assert jnp.allclose(std, std_ref, atol=1e-6, rtol=1e-6), \
        float(jnp.max(jnp.abs(std - std_ref)))
    assert adj_rec is None


if __name__ == "__main__":
    key = jax.random.PRNGKey(0)
    k1, k2 = jax.random.split(key)

    # Small shape consistent with the module's toy usage.
    _run_case(k1, N=8, K=32, F_OUT=16, NB=3)
    # Larger, non-aligned shape: exercises padding, multi-tile row grid and
    # the F grid axis.
    _run_case(k2, N=700, K=96, F_OUT=200, NB=5)

    print("KERNEL_OK")
</pallas_src>

<mosaic_0001>
module attributes {stable_mosaic.version = 11 : i64} {
  func.func @_decoder_kernel(%arg0: i32, %arg1: i32, %arg2: memref<8x1xi32, #tpu.memory_space<vmem>>, %arg3: memref<8x128xf32, #tpu.memory_space<vmem>>, %arg4: memref<128x128xf32, #tpu.memory_space<vmem>>, %arg5: memref<8x128xf32, #tpu.memory_space<vmem>>, %arg6: memref<8x128xf32, #tpu.memory_space<vmem>>, %arg7: memref<8x128xf32, #tpu.memory_space<vmem>>, %arg8: memref<8x128xf32, #tpu.memory_space<vmem>>, %arg9: memref<8x128xf32, #tpu.memory_space<vmem>>) attributes {dimension_semantics = [#tpu.dimension_semantics<parallel>, #tpu.dimension_semantics<parallel>], iteration_bounds = array<i64: 1, 1>, scalar_prefetch = 0 : i64, scratch_operands = 0 : i64, tpu.core_type = #tpu.core_type<tc>, window_params = [{transform_indices = @transform_0, window_bounds = array<i64: 8, 1>}, {transform_indices = @transform_1, window_bounds = array<i64: 8, 128>}, {transform_indices = @transform_2, window_bounds = array<i64: 128, 128>}, {transform_indices = @transform_3, window_bounds = array<i64: 8, 128>}, {transform_indices = @transform_4, window_bounds = array<i64: 8, 128>}, {transform_indices = @transform_5, window_bounds = array<i64: 8, 128>}, {transform_indices = @transform_6, window_bounds = array<i64: 8, 128>}, {transform_indices = @transform_7, window_bounds = array<i64: 8, 128>}]} {
    %c0 = arith.constant 0 : index
    %c0_0 = arith.constant 0 : index
    %0 = vector.load %arg3[%c0, %c0_0] : memref<8x128xf32, #tpu.memory_space<vmem>>, vector<8x128xf32>
    %c0_1 = arith.constant 0 : index
    %c0_2 = arith.constant 0 : index
    %1 = vector.load %arg4[%c0_1, %c0_2] : memref<128x128xf32, #tpu.memory_space<vmem>>, vector<128x128xf32>
    %cst = arith.constant dense<0.000000e+00> : vector<8x128xf32>
    %2 = tpu.matmul %0, %1, %cst {dimension_numbers = #tpu.dot_dimension_numbers<[1], [1], [0], [0], [0, 0, 1, 0], [], []>} : vector<8x128xf32>, vector<128x128xf32>, vector<8x128xf32> -> vector<8x128xf32>
    %3 = tpu.iota {dimensions = array<i32: 1>} : vector<8x8xi32>
    %c0_3 = arith.constant 0 : index
    %c0_4 = arith.constant 0 : index
    %4 = vector.load %arg2[%c0_3, %c0_4] : memref<8x1xi32, #tpu.memory_space<vmem>>, vector<8x1xi32>
    %5 = vector.broadcast %4 : vector<8x1xi32> to vector<8x8xi32>
    %6 = arith.cmpi eq, %3, %5 : vector<8x8xi32>
    %7 = arith.extui %6 : vector<8x8xi1> to vector<8x8xi32>
    %8 = arith.sitofp %7 : vector<8x8xi32> to vector<8x8xf32>
    %c0_5 = arith.constant 0 : index
    %c0_6 = arith.constant 0 : index
    %9 = vector.load %arg5[%c0_5, %c0_6] : memref<8x128xf32, #tpu.memory_space<vmem>>, vector<8x128xf32>
    %cst_7 = arith.constant dense<0.000000e+00> : vector<8x128xf32>
    %10 = tpu.matmul %8, %9, %cst_7 {dimension_numbers = #tpu.dot_dimension_numbers<[1], [0], [0], [1], [0, 0, 1, 1], [], []>, precision = #tpu.contract_precision<fp32>} : vector<8x8xf32>, vector<8x128xf32>, vector<8x128xf32> -> vector<8x128xf32>
    %c0_8 = arith.constant 0 : index
    %c0_9 = arith.constant 0 : index
    %11 = vector.load %arg6[%c0_8, %c0_9] : memref<8x128xf32, #tpu.memory_space<vmem>>, vector<8x128xf32>
    %cst_10 = arith.constant dense<0.000000e+00> : vector<8x128xf32>
    %12 = tpu.matmul %8, %11, %cst_10 {dimension_numbers = #tpu.dot_dimension_numbers<[1], [0], [0], [1], [0, 0, 1, 1], [], []>, precision = #tpu.contract_precision<fp32>} : vector<8x8xf32>, vector<8x128xf32>, vector<8x128xf32> -> vector<8x128xf32>
    %c0_11 = arith.constant 0 : index
    %c0_12 = arith.constant 0 : index
    %13 = vector.load %arg7[%c0_11, %c0_12] : memref<8x128xf32, #tpu.memory_space<vmem>>, vector<8x128xf32>
    %cst_13 = arith.constant dense<0.000000e+00> : vector<8x128xf32>
    %14 = tpu.matmul %8, %13, %cst_13 {dimension_numbers = #tpu.dot_dimension_numbers<[1], [0], [0], [1], [0, 0, 1, 1], [], []>, precision = #tpu.contract_precision<fp32>} : vector<8x8xf32>, vector<8x128xf32>, vector<8x128xf32> -> vector<8x128xf32>
    %15 = arith.mulf %10, %2 : vector<8x128xf32>
    %16 = arith.addf %15, %12 : vector<8x128xf32>
    %c0_14 = arith.constant 0 : index
    %c0_15 = arith.constant 0 : index
    %17 = vector.load %arg8[%c0_14, %c0_15] : memref<8x128xf32, #tpu.memory_space<vmem>>, vector<8x128xf32>
    tpu.vector_store %arg8[%c0_14, %c0_15], %16 {strides = array<i32>} : memref<8x128xf32, #tpu.memory_space<vmem>>, vector<8x128xf32>,
    %c0_16 = arith.constant 0 : index
    %c0_17 = arith.constant 0 : index
    %18 = vector.load %arg9[%c0_16, %c0_17] : memref<8x128xf32, #tpu.memory_space<vmem>>, vector<8x128xf32>
    tpu.vector_store %arg9[%c0_16, %c0_17], %14 {strides = array<i32>} : memref<8x128xf32, #tpu.memory_space<vmem>>, vector<8x128xf32>,
    return
  }
  func.func @transform_0(%arg0: i32, %arg1: i32) -> (i32, i32) {
    %c0_i32 = arith.constant 0 : i32
    %c0_i32_0 = arith.constant 0 : i32
    return %arg0, %c0_i32 : i32, i32
  }
  func.func @transform_1(%arg0: i32, %arg1: i32) -> (i32, i32) {
    %c0_i32 = arith.constant 0 : i32
    %c0_i32_0 = arith.constant 0 : i32
    return %arg0, %c0_i32 : i32, i32
  }
  func.func @transform_2(%arg0: i32, %arg1: i32) -> (i32, i32) {
    %c0_i32 = arith.constant 0 : i32
    %c0_i32_0 = arith.constant 0 : i32
    return %arg1, %c0_i32 : i32, i32
  }
  func.func @transform_3(%arg0: i32, %arg1: i32) -> (i32, i32) {
    %c0_i32 = arith.constant 0 : i32
    %c0_i32_0 = arith.constant 0 : i32
    return %c0_i32, %arg1 : i32, i32
  }
  func.func @transform_4(%arg0: i32, %arg1: i32) -> (i32, i32) {
    %c0_i32 = arith.constant 0 : i32
    %c0_i32_0 = arith.constant 0 : i32
    return %c0_i32, %arg1 : i32, i32
  }
  func.func @transform_5(%arg0: i32, %arg1: i32) -> (i32, i32) {
    %c0_i32 = arith.constant 0 : i32
    %c0_i32_0 = arith.constant 0 : i32
    return %c0_i32, %arg1 : i32, i32
  }
  func.func @transform_6(%arg0: i32, %arg1: i32) -> (i32, i32) {
    %c0_i32 = arith.constant 0 : i32
    return %arg0, %arg1 : i32, i32
  }
  func.func @transform_7(%arg0: i32, %arg1: i32) -> (i32, i32) {
    %c0_i32 = arith.constant 0 : i32
    return %arg0, %arg1 : i32, i32
  }
}

</mosaic_0001>

<bundles_post_ra>
// kernel: normal_data_decoder.1
= control target key start
LH: loop header
LB: loop body
LE: loop exit
PB: predicated region body
PF: predicated region fallthrough
CT: control target
= control target key end

     0   :  { %13 = vsyncpa [#allocation3], 0  ;;  %v1738_v2 = vmov 0   ;;  %v1739_v3 = vmov 0.0   ;;  %vm1740_vm0 = vmmov 0   ;;  %s1979_s0 = inlined_call_operand.vmem [shape: s32[8,1], index: 0, kind: input, shape index: {}]   ;;  %s1980_s1 = inlined_call_operand.vmem [shape: f32[8,128], index: 1, kind: input, shape index: {}]   ;;  %s1981_s2 = inlined_call_operand.vmem [shape: f32[128,128], index: 2, kind: input, shape index: {}]   ;;  %s1982_s3 = inlined_call_operand.vmem [shape: f32[8,128], index: 3, kind: input, shape index: {}]   ;;  %s1983_s4 = inlined_call_operand.vmem [shape: f32[8,128], index: 4, kind: input, shape index: {}]   ;;  %s1984_s5 = inlined_call_operand.vmem [shape: f32[8,128], index: 5, kind: input, shape index: {}]   ;;  %s1985_s6 = inlined_call_operand.hbm [shape: f32[8,128], index: 6, kind: output, shape index: {0}]   ;;  %s1986_s7 = inlined_call_operand.hbm [shape: f32[8,128], index: 7, kind: output, shape index: {1}]  }
   0x1   :  { %v116_v0 = vld [vmem:[%s1979_s0] sm:$0xff]  ;;  %v43_v1 = vld [vmem:[%s1981_s2 + $0x78] sm:$0xff]  ;;  %1693 = vset.pattern.permute.xlu0 %v1738_v2  ;;  %1563 = vmatprep.subr.mxu0 %v1739_v3  ;;  %v42_v4 = vld [vmem:[%s1981_s2 + $0x70] sm:$0xff] }
   0x2   :  { %118 = vperm.xlu0 %1693, %v116_v0   ;;  %1564 = vmatpush3.xpose.msra.mxu0 %v43_v1  ;;  %v123_v5 = vld [vmem:[%s1982_s3] sm:$0xff] }
   0x3   :  { %1565 = vmatprep.subr.mxu0 %v1739_v3  ;;  %1595 = vmatprep.mubr.msk.f32.mxu0 %vm1740_vm0, %v1739_v3 }
   0x4   :  { %1598 = vmatprep.subr.mxu1 %v1739_v3  ;;  %1600 = vmatprep.mubr.msk.f32.mxu1 %vm1740_vm0, %v1739_v3 }
   0x6   :  { %1566 = vmatpush3.xpose.msra.mxu0 %v42_v4 }
   0x7   :  { %14 = vsyncpa [#allocation5], 0  ;;  %1567 = vmatprep.subr.mxu0 %v1739_v3  ;;  %v41_v6 = vld [vmem:[%s1981_s2 + $0x68] sm:$0xff]  ;;  %v1806_v7 = vand.u32 4294901760, %v123_v5  ;;  %v40_v8 = vld [vmem:[%s1981_s2 + $0x60] sm:$0xff]  ;;  %v114_v24 = vlaneseq  ;;  %vm124_vm1 = vcmask 64512  }
   0x8   :  { %v39_v9 = vld [vmem:[%s1981_s2 + $0x58] sm:$0xff]  ;;  %v38_v10 = vld [vmem:[%s1981_s2 + $0x50] sm:$0xff]  ;;  %v37_v11 = vld [vmem:[%s1981_s2 + $0x48] sm:$0xff] }
   0x9   :  { %1599 = vmatpush3.msra.mxu1 %v1806_v7  ;;  %v36_v12 = vld [vmem:[%s1981_s2 + $0x40] sm:$0xff]  ;;  %v35_v13 = vld [vmem:[%s1981_s2 + $0x38] sm:$0xff]  ;;  %v34_v14 = vld [vmem:[%s1981_s2 + $0x30] sm:$0xff]  ;;  %v115_v25 = vand.u32 127, %v114_v24  ;;  %v236_v26 = vsub.f32 %v123_v5, %v1806_v7 }
   0xa   :  { %1568 = vmatpush3.xpose.msra.mxu0 %v41_v6  ;;  %1603 = vmatprep.subr.mxu1 %v1739_v3  ;;  %v33_v15 = vld [vmem:[%s1981_s2 + $0x28] sm:$0xff]  ;;  %v32_v16 = vld [vmem:[%s1981_s2 + $0x20] sm:$0xff]  ;;  %v31_v17 = vld [vmem:[%s1981_s2 + $0x18] sm:$0xff] }
   0xb   :  { %1569 = vmatprep.subr.mxu0 %v1739_v3  ;;  %v30_v18 = vld [vmem:[%s1981_s2 + $0x10] sm:$0xff]  ;;  %v29_v19 = vld [vmem:[%s1981_s2 + $0x8] sm:$0xff]  ;;  %v28_v20 = vld [vmem:[%s1981_s2] sm:$0xff]  ;;  %v237_v28 = vand.u32 4294901760, %v236_v26 }
   0xc   :  { %v1865_v21 = vld [vmem:[%s1984_s5] sm:$0xff] }
   0xd   :  { %v27_v22 = vld [vmem:[%s1980_s1] sm:$0xff]  ;;  %v1871_v23 = vand.u32 4294901760, %v1865_v21  ;;  %v238_v32 = vsub.f32 %v236_v26, %v237_v28 }
   0xe   :  { %1570 = vmatpush3.xpose.msra.mxu0 %v40_v8  ;;  %v574_v37 = vld [vmem:[%s1983_s4] sm:$0xff]  ;;  %s1741_s4 = smov [#allocation2]  }
   0xf   :  { %1571 = vmatprep.subr.mxu0 %v1739_v3  ;;  %v239_v35 = vand.u32 4294901760, %v238_v32  ;;  %v606_v38 = vand.u32 4294901760, %v574_v37  ;;  %v1130_v43 = vsub.f32 %v1865_v21, %v1871_v23  ;;  %s1478_s5 = sshll.u32 %s1741_s4, 4  ;;  %s1479_s5 = int_to_ptr.vmem [resolvable:$true] %s1478_s5 }
  0x10   :  { %s1694_s14 = scalar_lea.vmem %s1479_s5, 128  ;;  %p1699_p1 = scmp.lt.s32.totalorder %s1479_s5, %s1479_s5 }
  0x11   :  { %v683_v39 = vsub.f32 %v574_v37, %v606_v38  ;;  %v1131_v44 = vand.u32 4294901760, %v1130_v43  ;;  %p1695_p0 = scmp.ne.s32.totalorder %s1479_s5, %s1694_s14  ;;  %p1700_p2 = scmp.lt.s32.totalorder %s1694_s14, %s1694_s14 }
  0x12   :  { %1572 = vmatpush3.xpose.msra.mxu0 %v39_v9 }
  0x13   :  { %1573 = vmatprep.subr.mxu0 %v1739_v3  ;;  %v684_v40 = vand.u32 4294901760, %v683_v39  ;;  %v1132_v45 = vsub.f32 %v1130_v43, %v1131_v44  ;;  %p1701_p3 = por %p1700_p2, %p1699_p1 }
  0x15   :  { %v685_v41 = vsub.f32 %v683_v39, %v684_v40  ;;  %v1133_v46 = vand.u32 4294901760, %v1132_v45  ;;  %p1702_p4 = pnand %p1701_p3, %p1695_p0 }
  0x16   :  { %1574 = vmatpush3.xpose.msra.mxu0 %v38_v10 }
  0x17   :  { %1575 = vmatprep.subr.mxu0 %v1739_v3  ;;  %v686_v42 = vand.u32 4294901760, %v685_v41 }
  0x1a   :  { %1576 = vmatpush3.xpose.msra.mxu0 %v37_v11 }
  0x1b   :  { %1577 = vmatprep.subr.mxu0 %v1739_v3 }
  0x1e   :  { %1578 = vmatpush3.xpose.msra.mxu0 %v36_v12 }
  0x1f   :  { %1579 = vmatprep.subr.mxu0 %v1739_v3 }
  0x22   :  { %1580 = vmatpush3.xpose.msra.mxu0 %v35_v13 }
  0x23   :  { %1581 = vmatprep.subr.mxu0 %v1739_v3 }
  0x26   :  { %1582 = vmatpush3.xpose.msra.mxu0 %v34_v14 }
  0x27   :  { %1583 = vmatprep.subr.mxu0 %v1739_v3 }
  0x2a   :  { %1584 = vmatpush3.xpose.msra.mxu0 %v33_v15 }
  0x2b   :  { %1585 = vmatprep.subr.mxu0 %v1739_v3 }
  0x2e   :  { %1586 = vmatpush3.xpose.msra.mxu0 %v32_v16 }
  0x2f   :  { %1587 = vmatprep.subr.mxu0 %v1739_v3 }
  0x32   :  { %1588 = vmatpush3.xpose.msra.mxu0 %v31_v17 }
  0x33   :  { %1589 = vmatprep.subr.mxu0 %v1739_v3 }
  0x36   :  { %1590 = vmatpush3.xpose.msra.mxu0 %v30_v18 }
  0x37   :  { %1591 = vmatprep.subr.mxu0 %v1739_v3 }
  0x3a   :  { %1592 = vmatpush3.xpose.msra.mxu0 %v29_v19 }
  0x3b   :  { %1593 = vmatprep.subr.mxu0 %v1739_v3 }
  0x3e   :  { %1594 = vmatpush3.xpose.msra.mxu0 %v28_v20 }
  0x3f   :  { %1683 = vmatprep.subr.mxu0 %v1739_v3 }
  0x41   :  { %1596 = vmatmul.mubr.f32.vlgmr.msra.gmra.mxu0 %v27_v22 }
  0x42   :  { %1684 = vmatpush3.msra.mxu0 %v1871_v23  ;;  %1685 = vmatprep.mubr.msk.f32.mxu0 %vm1740_vm0, %v1739_v3 }
  0x7d   :  { %v119_v27 = vpop.permute.xlu0 %118 }
  0x7e   :  { %vm120_vm2 = vcmp.eq.s32.totalorder %v115_v25, %v119_v27 }
  0x7f   :  { %v1879_v29 = vsel %vm120_vm2, 1.0, %v1739_v3 }
  0x80   :  { %1686 = vmatmul.mubr.msk.f32.vlgmr.msra.gmra.mxu0 %vm124_vm1, %v1879_v29  ;;  %v126_v30 = vsel %vm124_vm1, %v1879_v29, 0 }
  0x81   :  { %v1885_v31 = vsub.f32 %v126_v30, %v126_v30 }
  0x83   :  { %v1888_v33 = vand.u32 4294901760, %v1885_v31 }
  0x85   :  { %v197_v34 = vsub.f32 %v1885_v31, %v1888_v33 }
  0x87   :  { %v198_v36 = vand.u32 4294901760, %v197_v34 }
  0x89   :  { %1601 = vmatmul.mubr.f32.vlgmr.msra.gmra.mxu1 %v198_v36 }
  0x8a   :  { %1604 = vmatpush3.msra.mxu1 %v239_v35  ;;  %1605 = vmatprep.mubr.msk.f32.mxu1 %vm1740_vm0, %v1739_v3 }
  0x8b   :  { %1608 = vmatprep.subr.mxu1 %v1739_v3 }
  0x8d   :  { %1606 = vmatmul.mubr.msk.f32.vlgmr.msra.gmra.mxu1 %vm124_vm1, %v1879_v29 }
  0x8e   :  { %1609 = vmatpush3.msra.mxu1 %v236_v26  ;;  %1610 = vmatprep.mubr.msk.f32.mxu1 %vm1740_vm0, %v1739_v3 }
  0x8f   :  { %1613 = vmatprep.subr.mxu1 %v1739_v3 }
  0x91   :  { %1611 = vmatmul.mubr.f32.vlgmr.msra.gmra.mxu1 %v1885_v31 }
  0x92   :  { %1614 = vmatpush3.msra.mxu1 %v1806_v7  ;;  %1615 = vmatprep.mubr.msk.f32.mxu1 %vm1740_vm0, %v1739_v3 }
  0x93   :  { %1618 = vmatprep.subr.mxu1 %v1739_v3 }
  0x95   :  { %1616 = vmatmul.mubr.f32.vlgmr.msra.gmra.mxu1 %v1888_v33 }
  0x96   :  { %1619 = vmatpush3.msra.mxu1 %v237_v28  ;;  %1620 = vmatprep.mubr.msk.f32.mxu1 %vm1740_vm0, %v1739_v3 }
  0x97   :  { %1623 = vmatprep.subr.mxu1 %v1739_v3 }
  0x99   :  { %1621 = vmatmul.mubr.msk.f32.vlgmr.msra.gmra.mxu1 %vm124_vm1, %v1879_v29 }
  0x9a   :  { %1624 = vmatpush3.msra.mxu1 %v1806_v7  ;;  %1625 = vmatprep.mubr.msk.f32.mxu1 %vm1740_vm0, %v1739_v3 }
  0x9b   :  { %1628 = vmatprep.subr.mxu1 %v1739_v3 }
  0x9d   :  { %1626 = vmatmul.mubr.msk.f32.vlgmr.msra.gmra.mxu1 %vm124_vm1, %v1879_v29 }
  0x9e   :  { %1629 = vmatpush3.msra.mxu1 %v606_v38  ;;  %1630 = vmatprep.mubr.msk.f32.mxu1 %vm1740_vm0, %v1739_v3 }
  0x9f   :  { %1633 = vmatprep.subr.mxu1 %v1739_v3 }
  0xa1   :  { %1631 = vmatmul.mubr.f32.vlgmr.msra.gmra.mxu1 %v198_v36 }
  0xa2   :  { %1634 = vmatpush3.msra.mxu1 %v686_v42  ;;  %1635 = vmatprep.mubr.msk.f32.mxu1 %vm1740_vm0, %v1739_v3 }
  0xa3   :  { %1638 = vmatprep.subr.mxu1 %v1739_v3 }
  0xa5   :  { %1636 = vmatmul.mubr.msk.f32.vlgmr.msra.gmra.mxu1 %vm124_vm1, %v1879_v29 }
  0xa6   :  { %1639 = vmatpush3.msra.mxu1 %v683_v39  ;;  %1640 = vmatprep.mubr.msk.f32.mxu1 %vm1740_vm0, %v1739_v3 }
  0xa7   :  { %1643 = vmatprep.subr.mxu1 %v1739_v3 }
  0xa9   :  { %1641 = vmatmul.mubr.f32.vlgmr.msra.gmra.mxu1 %v1885_v31 }
  0xaa   :  { %1644 = vmatpush3.msra.mxu1 %v606_v38  ;;  %1645 = vmatprep.mubr.msk.f32.mxu1 %vm1740_vm0, %v1739_v3 }
  0xab   :  { %1648 = vmatprep.subr.mxu1 %v1739_v3 }
  0xad   :  { %1646 = vmatmul.mubr.f32.vlgmr.msra.gmra.mxu1 %v1888_v33 }
  0xae   :  { %1649 = vmatpush3.msra.mxu1 %v684_v40  ;;  %1650 = vmatprep.mubr.msk.f32.mxu1 %vm1740_vm0, %v1739_v3 }
  0xaf   :  { %1653 = vmatprep.subr.mxu1 %v1739_v3 }
  0xb1   :  { %1651 = vmatmul.mubr.msk.f32.vlgmr.msra.gmra.mxu1 %vm124_vm1, %v1879_v29 }
  0xb2   :  { %1654 = vmatpush3.msra.mxu1 %v606_v38  ;;  %1655 = vmatprep.mubr.msk.f32.mxu1 %vm1740_vm0, %v1739_v3 }
  0xb3   :  { %1658 = vmatprep.subr.mxu1 %v1739_v3 }
  0xb5   :  { %1656 = vmatmul.mubr.msk.f32.vlgmr.msra.gmra.mxu1 %vm124_vm1, %v1879_v29 }
  0xb6   :  { %1659 = vmatpush3.msra.mxu1 %v1871_v23  ;;  %1660 = vmatprep.mubr.msk.f32.mxu1 %vm1740_vm0, %v1739_v3 }
  0xb7   :  { %1663 = vmatprep.subr.mxu1 %v1739_v3 }
  0xb9   :  { %1661 = vmatmul.mubr.f32.vlgmr.msra.gmra.mxu1 %v198_v36 }
  0xba   :  { %1664 = vmatpush3.msra.mxu1 %v1133_v46  ;;  %1665 = vmatprep.mubr.msk.f32.mxu1 %vm1740_vm0, %v1739_v3 }
  0xbb   :  { %1668 = vmatprep.subr.mxu1 %v1739_v3 }
  0xbd   :  { %1666 = vmatmul.mubr.msk.f32.vlgmr.msra.gmra.mxu1 %vm124_vm1, %v1879_v29 }
  0xbe   :  { %1669 = vmatpush3.msra.mxu1 %v1130_v43  ;;  %1670 = vmatprep.mubr.msk.f32.mxu1 %vm1740_vm0, %v1739_v3 }
  0xbf   :  { %1673 = vmatprep.subr.mxu1 %v1739_v3 }
  0xc1   :  { %1671 = vmatmul.mubr.f32.vlgmr.msra.gmra.mxu1 %v1885_v31 }
  0xc2   :  { %1674 = vmatpush3.msra.mxu1 %v1871_v23  ;;  %1675 = vmatprep.mubr.msk.f32.mxu1 %vm1740_vm0, %v1739_v3 }
  0xc3   :  { %1678 = vmatprep.subr.mxu1 %v1739_v3 }
  0xc5   :  { %1676 = vmatmul.mubr.f32.vlgmr.msra.gmra.mxu1 %v1888_v33 }
  0xc6   :  { %1679 = vmatpush3.msra.mxu1 %v1131_v44  ;;  %1680 = vmatprep.mubr.msk.f32.mxu1 %vm1740_vm0, %v1739_v3 }
  0xc9   :  { %1681 = vmatmul.mubr.msk.f32.vlgmr.msra.gmra.mxu1 %vm124_vm1, %v1879_v29 }
 0x101   :  { %v110_v47 = vpop.f32.mrf.mxu0 }
 0x103   :  { %v1597_v48 = vpop.f32.mrf.mxu0 }
 0x140   :  { %v1970_v49 = vpop.f32.mrf.mxu0 }
 0x142   :  { %v1687_v50 = vpop.f32.mrf.mxu0 }
 0x149   :  { %v200_v51 = vpop.f32.mrf.mxu1 }
 0x14b   :  { %v1602_v52 = vpop.f32.mrf.mxu1 }
 0x14d   :  { %v276_v53 = vpop.f32.mrf.mxu1 }
 0x14e   :  { %v277_v4 = vadd.f32 %v276_v53, %v200_v51 }
 0x14f   :  { %v1607_v54 = vpop.f32.mrf.mxu1 }
 0x151   :  { %v350_v55 = vpop.f32.mrf.mxu1 }
 0x152   :  { %v351_v6 = vadd.f32 %v350_v55, %v277_v4 }
 0x153   :  { %v1612_v56 = vpop.f32.mrf.mxu1 }
 0x155   :  { %v424_v57 = vpop.f32.mrf.mxu1 }
 0x156   :  { %v425_v8 = vadd.f32 %v424_v57, %v351_v6 }
 0x157   :  { %v1617_v58 = vpop.f32.mrf.mxu1 }
 0x159   :  { %v498_v59 = vpop.f32.mrf.mxu1 }
 0x15a   :  { %v499_v11 = vadd.f32 %v498_v59, %v425_v8 }
 0x15b   :  { %v1622_v60 = vpop.f32.mrf.mxu1 }
 0x15d   :  { %v570_v61 = vpop.f32.mrf.mxu1 }
 0x15e   :  { %v571_v14 = vadd.f32 %v570_v61, %v499_v11 }
 0x15f   :  { %v1627_v62 = vpop.f32.mrf.mxu1 }
 0x160   :  { %v1468_v19 = vmul.f32 %v571_v14, %v110_v47 }
 0x161   :  { %v647_v63 = vpop.f32.mrf.mxu1 }
 0x163   :  { %v1632_v0 = vpop.f32.mrf.mxu1 }
 0x165   :  { %v723_v1 = vpop.f32.mrf.mxu1 }
 0x166   :  { %v724_v9 = vadd.f32 %v723_v1, %v647_v63 }
 0x167   :  { %v1637_v2 = vpop.f32.mrf.mxu1 }
 0x169   :  { %v797_v3 = vpop.f32.mrf.mxu1 }
 0x16a   :  { %v798_v12 = vadd.f32 %v797_v3, %v724_v9 }
 0x16b   :  { %v1642_v5 = vpop.f32.mrf.mxu1 }
 0x16d   :  { %v871_v7 = vpop.f32.mrf.mxu1 }
 0x16e   :  { %v872_v15 = vadd.f32 %v871_v7, %v798_v12 }
 0x16f   :  { %v1647_v10 = vpop.f32.mrf.mxu1 }
 0x171   :  { %v945_v13 = vpop.f32.mrf.mxu1 }
 0x172   :  { %v946_v17 = vadd.f32 %v945_v13, %v872_v15 }
 0x173   :  { %v1652_v16 = vpop.f32.mrf.mxu1 }
 0x175   :  { %v1017_v18 = vpop.f32.mrf.mxu1 }
 0x176   :  { %v1018_v20 = vadd.f32 %v1017_v18, %v946_v17 }
 0x177   :  { %v1657_v21 = vpop.f32.mrf.mxu1 }
 0x178   :  { %v1469_v22 = vadd.f32 %v1468_v19, %v1018_v20 }
 0x179   :  { %v1094_v23 = vpop.f32.mrf.mxu1 }
 0x17a   :  { %1470 = vst [vmem:[#allocation2] sm:$0xff] %v1469_v22 }
 0x17b   :  { %v1662_v24 = vpop.f32.mrf.mxu1 }
 0x17c   :  { %1705 = shalt.err (!%p1702_p4)
}
 0x17d   :  { %1481 = dma.vmem_to_hbm [thread:$0]  %s1479_s5, 128, %s1985_s6, [#allocation3]   ;;  %v1170_v25 = vpop.f32.mrf.mxu1 }
 0x17e   :  { %v1171_v29 = vadd.f32 %v1170_v25, %v1094_v23  ;;  %s1742_s17 = smov [#allocation4]  }
 0x17f   :  { %v1667_v26 = vpop.f32.mrf.mxu1  ;;  %s1488_s18 = sshll.u32 %s1742_s17, 4  ;;  %s1489_s18 = int_to_ptr.vmem [resolvable:$true] %s1488_s18 }
 0x180   :  { %s1714_s19 = scalar_lea.vmem %s1489_s18, 128  ;;  %p1719_p6 = scmp.lt.s32.totalorder %s1489_s18, %s1489_s18 }
 0x181   :  { %v1244_v27 = vpop.f32.mrf.mxu1  ;;  %p1715_p5 = scmp.ne.s32.totalorder %s1489_s18, %s1714_s19  ;;  %p1720_p7 = scmp.lt.s32.totalorder %s1714_s19, %s1714_s19 }
 0x182   :  { %v1245_v31 = vadd.f32 %v1244_v27, %v1171_v29 }
 0x183   :  { %v1672_v28 = vpop.f32.mrf.mxu1  ;;  %p1721_p8 = por %p1720_p7, %p1719_p6 }
 0x185   :  { %v1318_v30 = vpop.f32.mrf.mxu1  ;;  %p1722_p9 = pnand %p1721_p8, %p1715_p5 }
 0x186   :  { %v1319_v33 = vadd.f32 %v1318_v30, %v1245_v31 }
 0x187   :  { %v1677_v32 = vpop.f32.mrf.mxu1 }
 0x189   :  { %v1392_v34 = vpop.f32.mrf.mxu1 }
 0x18a   :  { %v1393_v35 = vadd.f32 %v1392_v34, %v1319_v33 }
 0x18b   :  { %v1682_v36 = vpop.f32.mrf.mxu1 }
 0x18c   :  { %v1465_v37 = vadd.f32 %v1970_v49, %v1393_v35 }
 0x18e   :  { %1471 = vst [vmem:[#allocation4] sm:$0xff] %v1465_v37 }
 0x18f   :  { %1725 = shalt.err (!%p1722_p9)
}
 0x190   :  { %1491 = dma.vmem_to_hbm [thread:$0]  %s1489_s18, 128, %s1986_s7, [#allocation5]  }
 0x191   :  { %1734 = dma.done.wait [#allocation3], 128  }
 0x192   :  { %1735 = vsyncadd [#allocation3], 4294967168 }
 0x193   :  { %1736 = dma.done.wait [#allocation5], 128  }
 0x194   :  { %1737 = vsyncadd [#allocation5], 4294967168 }
 0x195   :  { %1498 = vsyncpa [#allocation3], 1 }
 0x196   :  { %1499 = vsyncpa [#allocation5], 1 }

</bundles_post_ra>
